<compile_context>
chip_gen: v6e
topology: v6e:2x2x1
jax: 0.10.0
libtpu: 0.0.40
codegen_flags: <defaults>
</compile_context>

<pallas_src>
import functools

import jax
import jax.numpy as jnp
from jax.experimental import pallas as pl
from jax.experimental.pallas import tpu as pltpu


def _round_up(n: int, m: int) -> int:
    return ((n + m - 1) // m) * m


def _batch_tile(batch: int, block_b: int) -> tuple:
    """Pick (batch_tile, padded_batch).

    The tile is a multiple of 16 (bf16 sublane packing).  When the batch is
    large enough, the grid length is kept even so the 'parallel' grid axis
    shards evenly across v7x's two TensorCores.
    """
    n = pl.cdiv(batch, block_b)
    if batch > 16:
        n = _round_up(n, 2)
    tb = _round_up(pl.cdiv(batch, n), 16)
    bp = _round_up(batch, tb)
    return tb, bp


# ----------------------------------------------------------------------------
# Pallas kernel: fused  y = tanh(x @ W1 + b1) @ W2 + b2   (one batch tile)
# ----------------------------------------------------------------------------
def _mlp_vf_kernel(x_ref, w1_ref, b1_ref, w2_ref, b2_ref, o_ref):
    # (TB, D) bf16 @ (D, Hp) bf16 -> f32 accumulation on the MXU.  K = D may
    # be < 128 (underfilled MXU); the kernel is HBM-bound so that is free.
    h = jnp.dot(x_ref[...], w1_ref[...], preferred_element_type=jnp.float32)
    # Bias + tanh in f32 on the VPU/EUP (v5e has no bf16 elementwise path).
    h = jnp.tanh(h + b1_ref[...])
    # Second MXU pass: bf16 operands, f32 accumulation, lane-dense Dp output.
    y = jnp.dot(h.astype(w2_ref.dtype), w2_ref[...],
                preferred_element_type=jnp.float32)
    o_ref[...] = (y + b2_ref[...]).astype(o_ref.dtype)


def _mlp_vf_padded(xp, w1p, b1p, w2p, b2p, *, tb):
    """pallas_call on an already row-padded bf16 state  xp: (Bp, D).

    Returns the padded (Bp, Dp) bf16 output (padded columns are exactly 0).
    Use this form inside a solver loop so the state stays in the kernel's
    native layout and no per-evaluation pad/slice passes hit HBM.
    """
    bp, d = xp.shape
    hp = w1p.shape[1]
    dp = w2p.shape[1]
    out_dtype = jnp.bfloat16           # halves output HBM bytes & vst count
    out_bytes = jnp.dtype(out_dtype).itemsize

    grid = (bp // tb,)

    # VMEM budget: resident weights/biases + double-buffered x/out tiles
    # + rough f32 intermediates.
    vmem_bytes = ((w1p.size + w2p.size) * 2 + (b1p.size + b2p.size) * 4
                  + 2 * tb * d * 2 + 2 * tb * dp * out_bytes
                  + tb * (hp + dp) * 4)
    vmem_limit = None
    if vmem_bytes > (32 << 20):
        # TODO(synk): for D/H ~2048+, switch to a K-tiled 'arbitrary' grid axis
        # with an f32 VMEM accumulator instead of raising the limit
        # (v7x only has 64 MiB physical VMEM).
        vmem_limit = min(int(vmem_bytes * 3 // 2), 96 << 20)

    flops = 2 * bp * d * hp + 2 * bp * hp * dp
    bytes_accessed = (xp.size * 2 + w1p.size * 2 + w2p.size * 2
                      + b1p.size * 4 + b2p.size * 4 + bp * dp * out_bytes)

    return pl.pallas_call(
        _mlp_vf_kernel,
        out_shape=jax.ShapeDtypeStruct((bp, dp), out_dtype),
        grid_spec=pl.GridSpec(
            grid=grid,
            in_specs=[
                pl.BlockSpec((tb, d), lambda i: (i, 0)),    # x: streamed
                pl.BlockSpec((d, hp), lambda i: (0, 0)),    # W1: VMEM-resident
                pl.BlockSpec((1, hp), lambda i: (0, 0)),    # b1: resident
                pl.BlockSpec((hp, dp), lambda i: (0, 0)),   # W2: resident
                pl.BlockSpec((1, dp), lambda i: (0, 0)),    # b2: resident
            ],
            out_specs=pl.BlockSpec((tb, dp), lambda i: (i, 0)),
        ),
        compiler_params=pltpu.CompilerParams(
            dimension_semantics=("parallel",),
            vmem_limit_bytes=vmem_limit),
        cost_estimate=pl.CostEstimate(
            flops=flops,
            transcendentals=bp * hp,
            bytes_accessed=bytes_accessed),
    )(xp, w1p, b1p, w2p, b2p)


@functools.partial(jax.jit, static_argnames=("tb", "bp"))
def _mlp_vf_forward(x, w1p, b1p, w2p, b2p, *, tb, bp):
    """Convenience one-shot path: pad batch rows, run kernel, strip padding."""
    b, d = x.shape
    xp = x.astype(jnp.bfloat16)
    if bp != b:
        xp = jnp.pad(xp, ((0, bp - b), (0, 0)))
    out = _mlp_vf_padded(xp, w1p, b1p, w2p, b2p, tb=tb)
    return out[:b, :d].astype(x.dtype)


# ----------------------------------------------------------------------------
# Vector-field model with weight prep hoisted to construction time
# ----------------------------------------------------------------------------
class MLPVectorField:
    """Canonical torchdyn vector field  m(x) = tanh(x @ W1 + b1) @ W2 + b2."""

    def __init__(self, w1, b1, w2, b2, *, block_b=512):
        d, h = w1.shape
        assert w2.shape == (h, d) and b1.shape == (h,) and b2.shape == (d,)
        self.d, self.h = d, h
        self.block_b = block_b
        hp = _round_up(h, 128)
        dp = _round_up(d, 128)
        # Hoisted once: pad ONLY the lane/N dims (W1 cols, W2 rows+cols); the
        # first matmul's K dim (= D) stays unpadded so x streams without lane
        # inflation.  Zero padding is exact: padded hidden cols are tanh(0)=0
        # into zero W2 rows, and padded output cols are 0 (sliced downstream).
        self.w1p = jnp.zeros((d, hp), jnp.bfloat16).at[:, :h].set(
            w1.astype(jnp.bfloat16))
        self.b1p = jnp.zeros((1, hp), jnp.float32).at[0, :h].set(
            b1.astype(jnp.float32))
        self.w2p = jnp.zeros((hp, dp), jnp.bfloat16).at[:h, :d].set(
            w2.astype(jnp.bfloat16))
        self.b2p = jnp.zeros((1, dp), jnp.float32).at[0, :d].set(
            b2.astype(jnp.float32))

    def padded_call(self, xp, *, tb):
        # For solver loops: keep the row-padded bf16 (Bp, D) state persistent
        # and consume the padded (Bp, Dp) bf16 output directly (no per-eval
        # pad/cast/slice HBM traffic).
        return _mlp_vf_padded(xp, self.w1p, self.b1p, self.w2p, self.b2p, tb=tb)

    def __call__(self, x):
        tb, bp = _batch_tile(x.shape[0], self.block_b)
        return _mlp_vf_forward(x, self.w1p, self.b1p, self.w2p, self.b2p,
                               tb=tb, bp=bp)


# ----------------------------------------------------------------------------
# DEFunc wrapper (JAX glue reproducing DEFunc / DEFuncTemplate.forward)
# ----------------------------------------------------------------------------
class DEFunc:
    def __init__(self, model_fn, order=1, func_type="classic"):
        self.m = model_fn
        self.nfe = 0.0          # NOTE: Python-side counter; not jit/scan safe.
        self.controlled = False
        self.func_type = func_type
        self.order = order
        self.dxds = None

    def __call__(self, s, x):
        # No DepthCat children in this synthetic model, so the `_set_s(s)`
        # loop in DEFunc.forward is a no-op here.
        self.nfe += 1
        if self.controlled:
            # TODO(synk): controlled variant (concat of control input u).
            raise NotImplementedError
        if self.func_type == "stable":
            # TODO(synk): 'stable' variant needs autograd through the Pallas
            # kernel (custom VJP); not implemented in this synthetic kernel.
            raise NotImplementedError
        if self.func_type == "higher_order" and self.order > 1:
            x = self._horder_forward(s, x)
        else:
            # TODO(synk): in a real ODE solver loop, fuse multiple RK stages /
            # steps into one pallas_call (in-kernel fori_loop or an 'arbitrary'
            # grid axis with the state in VMEM scratch), or cross-call weight
            # prefetch (P10), to amortize launch + W1/W2 DMA overhead.
            x = self.m(x)
        self.dxds = x
        return x

    def _horder_forward(self, s, x):
        size_order = x.shape[1] // self.order
        pieces = [x[:, size_order * i: size_order * (i + 1)]
                  for i in range(self.order - 1)]
        pieces.append(self.m(x))
        return jnp.concatenate(pieces, axis=1).astype(x.dtype)


# ----------------------------------------------------------------------------
# Demo / self-test
# ----------------------------------------------------------------------------
if __name__ == "__main__":
    B, D, H = 8, 32, 64   # batch, state dim, hidden width

    key = jax.random.PRNGKey(0)
    kx, k1, k2, k3, k4 = jax.random.split(key, 5)

    x = jax.random.normal(kx, (B, D), dtype=jnp.float32)
    w1 = jax.random.normal(k1, (D, H), dtype=jnp.float32) * 0.1
    b1 = jax.random.normal(k2, (H,), dtype=jnp.float32) * 0.1
    w2 = jax.random.normal(k3, (H, D), dtype=jnp.float32) * 0.1
    b2 = jax.random.normal(k4, (D,), dtype=jnp.float32) * 0.1

    model = MLPVectorField(w1, b1, w2, b2)            # weight prep hoisted here
    defunc = DEFunc(model, order=1, func_type="classic")

    s = jnp.float32(0.0)                 # integration time (unused: classic)
    out = defunc(s, x)
    out = jax.block_until_ready(out)

    # Reference emulating the kernel's bf16-operand / f32-accumulate path with
    # a bf16 store at the output.
    f32 = jnp.float32
    xb = x.astype(jnp.bfloat16).astype(f32)
    w1b = w1.astype(jnp.bfloat16).astype(f32)
    w2b = w2.astype(jnp.bfloat16).astype(f32)
    h_ref = jnp.tanh(xb @ w1b + b1)
    ref = h_ref.astype(jnp.bfloat16).astype(f32) @ w2b + b2
    ref = ref.astype(jnp.bfloat16).astype(f32)

    assert out.shape == (B, D)
    assert out.dtype == x.dtype
    assert defunc.nfe == 1.0
    max_err = float(jnp.max(jnp.abs(out - ref)))
    assert jnp.allclose(out, ref, atol=2e-2, rtol=2e-2), max_err

    print("KERNEL_OK")
</pallas_src>

<mosaic_0001>
module attributes {stable_mosaic.version = 11 : i64} {
  func.func @_mlp_vf_kernel(%arg0: i32, %arg1: memref<16x32xbf16, #tpu.memory_space<vmem>>, %arg2: memref<32x128xbf16, #tpu.memory_space<vmem>>, %arg3: memref<1x128xf32, #tpu.memory_space<vmem>>, %arg4: memref<128x128xbf16, #tpu.memory_space<vmem>>, %arg5: memref<1x128xf32, #tpu.memory_space<vmem>>, %arg6: memref<16x128xbf16, #tpu.memory_space<vmem>>) attributes {dimension_semantics = [#tpu.dimension_semantics<parallel>], iteration_bounds = array<i64: 1>, scalar_prefetch = 0 : i64, scratch_operands = 0 : i64, tpu.core_type = #tpu.core_type<tc>, window_params = [{transform_indices = @transform_0, window_bounds = array<i64: 16, 32>}, {pipeline_mode = #tpu.pipeline_mode<synchronous>, transform_indices = @transform_1, window_bounds = array<i64: 32, 128>}, {pipeline_mode = #tpu.pipeline_mode<synchronous>, transform_indices = @transform_2, window_bounds = array<i64: 1, 128>}, {pipeline_mode = #tpu.pipeline_mode<synchronous>, transform_indices = @transform_3, window_bounds = array<i64: 128, 128>}, {pipeline_mode = #tpu.pipeline_mode<synchronous>, transform_indices = @transform_4, window_bounds = array<i64: 1, 128>}, {transform_indices = @transform_5, window_bounds = array<i64: 16, 128>}]} {
    %c0 = arith.constant 0 : index
    %c0_0 = arith.constant 0 : index
    %0 = vector.load %arg1[%c0, %c0_0] : memref<16x32xbf16, #tpu.memory_space<vmem>>, vector<16x32xbf16>
    %c0_1 = arith.constant 0 : index
    %c0_2 = arith.constant 0 : index
    %1 = vector.load %arg2[%c0_1, %c0_2] : memref<32x128xbf16, #tpu.memory_space<vmem>>, vector<32x128xbf16>
    %cst = arith.constant dense<0.000000e+00> : vector<16x128xf32>
    %2 = tpu.matmul %0, %1, %cst {dimension_numbers = #tpu.dot_dimension_numbers<[1], [0], [0], [1], [0, 0, 1, 1], [], []>} : vector<16x32xbf16>, vector<32x128xbf16>, vector<16x128xf32> -> vector<16x128xf32>
    %c0_3 = arith.constant 0 : index
    %c0_4 = arith.constant 0 : index
    %3 = vector.load %arg3[%c0_3, %c0_4] : memref<1x128xf32, #tpu.memory_space<vmem>>, vector<1x128xf32>
    %4 = vector.broadcast %3 : vector<1x128xf32> to vector<16x128xf32>
    %5 = arith.addf %2, %4 : vector<16x128xf32>
    %6 = math.tanh %5 : vector<16x128xf32>
    %7 = arith.truncf %6 : vector<16x128xf32> to vector<16x128xbf16>
    %c0_5 = arith.constant 0 : index
    %c0_6 = arith.constant 0 : index
    %8 = vector.load %arg4[%c0_5, %c0_6] : memref<128x128xbf16, #tpu.memory_space<vmem>>, vector<128x128xbf16>
    %cst_7 = arith.constant dense<0.000000e+00> : vector<16x128xf32>
    %9 = tpu.matmul %7, %8, %cst_7 {dimension_numbers = #tpu.dot_dimension_numbers<[1], [0], [0], [1], [0, 0, 1, 1], [], []>} : vector<16x128xbf16>, vector<128x128xbf16>, vector<16x128xf32> -> vector<16x128xf32>
    %c0_8 = arith.constant 0 : index
    %c0_9 = arith.constant 0 : index
    %10 = vector.load %arg5[%c0_8, %c0_9] : memref<1x128xf32, #tpu.memory_space<vmem>>, vector<1x128xf32>
    %11 = vector.broadcast %10 : vector<1x128xf32> to vector<16x128xf32>
    %12 = arith.addf %9, %11 : vector<16x128xf32>
    %13 = arith.truncf %12 : vector<16x128xf32> to vector<16x128xbf16>
    %c0_10 = arith.constant 0 : index
    %c0_11 = arith.constant 0 : index
    %14 = vector.load %arg6[%c0_10, %c0_11] : memref<16x128xbf16, #tpu.memory_space<vmem>>, vector<16x128xbf16>
    tpu.vector_store %arg6[%c0_10, %c0_11], %13 {strides = array<i32>} : memref<16x128xbf16, #tpu.memory_space<vmem>>, vector<16x128xbf16>,
    return
  }
  func.func @transform_0(%arg0: i32) -> (i32, i32) {
    %c0_i32 = arith.constant 0 : i32
    %c0_i32_0 = arith.constant 0 : i32
    return %arg0, %c0_i32 : i32, i32
  }
  func.func @transform_1(%arg0: i32) -> (i32, i32) {
    %c0_i32 = arith.constant 0 : i32
    %c0_i32_0 = arith.constant 0 : i32
    %c0_i32_1 = arith.constant 0 : i32
    return %c0_i32, %c0_i32_0 : i32, i32
  }
  func.func @transform_2(%arg0: i32) -> (i32, i32) {
    %c0_i32 = arith.constant 0 : i32
    %c0_i32_0 = arith.constant 0 : i32
    %c0_i32_1 = arith.constant 0 : i32
    return %c0_i32, %c0_i32_0 : i32, i32
  }
  func.func @transform_3(%arg0: i32) -> (i32, i32) {
    %c0_i32 = arith.constant 0 : i32
    %c0_i32_0 = arith.constant 0 : i32
    %c0_i32_1 = arith.constant 0 : i32
    return %c0_i32, %c0_i32_0 : i32, i32
  }
  func.func @transform_4(%arg0: i32) -> (i32, i32) {
    %c0_i32 = arith.constant 0 : i32
    %c0_i32_0 = arith.constant 0 : i32
    %c0_i32_1 = arith.constant 0 : i32
    return %c0_i32, %c0_i32_0 : i32, i32
  }
  func.func @transform_5(%arg0: i32) -> (i32, i32) {
    %c0_i32 = arith.constant 0 : i32
    %c0_i32_0 = arith.constant 0 : i32
    return %arg0, %c0_i32 : i32, i32
  }
}

</mosaic_0001>

<bundles_post_ra>
// kernel: _mlp_vf_forward.1
= control target key start
LH: loop header
LB: loop body
LE: loop exit
PB: predicated region body
PF: predicated region fallthrough
CT: control target
= control target key end

     0   :  { %10 = vsyncpa [#allocation3], 0  ;;  %s345_s18 = smov [#allocation2]   ;;  %s401_s0 = inlined_call_operand.vmem [shape: bf16[16,32], index: 0, kind: input, shape index: {}]   ;;  %s402_s1 = inlined_call_operand.vmem [shape: bf16[32,128], index: 1, kind: input, shape index: {}]   ;;  %s403_s2 = inlined_call_operand.vmem [shape: f32[1,128], index: 2, kind: input, shape index: {}]   ;;  %s404_s3 = inlined_call_operand.hbm [shape: bf16[128,128], index: 3, kind: input, shape index: {}]   ;;  %s405_s4 = inlined_call_operand.vmem [shape: f32[1,128], index: 4, kind: input, shape index: {}]   ;;  %s406_s5 = inlined_call_operand.vmem [shape: bf16[16,128], index: 5, kind: output, shape index: {}]  }
   0x1   :  { %s22_s19 = sshll.u32 %s345_s18, 4  ;;  %s23_s19 = int_to_ptr.vmem [resolvable:$true] %s22_s19 }
   0x2   :  { %s331_s20 = scalar_lea.vmem %s23_s19, 1024  ;;  %p336_p1 = scmp.lt.s32.totalorder %s23_s19, %s23_s19 }
   0x3   :  { %p332_p0 = scmp.ne.s32.totalorder %s23_s19, %s331_s20  ;;  %p337_p2 = scmp.lt.s32.totalorder %s331_s20, %s331_s20 }
   0x5   :  { %p338_p3 = por %p337_p2, %p336_p1 }
   0x7   :  { %p339_p4 = pnand %p338_p3, %p332_p0 }
   0x9   :  { %342 = shalt.err (!%p339_p4)
}
   0xa   :  { %s346_s21 = smov 64   ;;  %s347_s22 = smov 4  }
   0xb   :  { %28 = dma.hbm_to_vmem [thread:$0]  %s404_s3, 1024, %s23_s19, [#allocation3], %s346_s21, %s346_s21, %s347_s22  }
   0xc   :  { %343 = dma.done.wait [#allocation3], 1024  }
   0xd   :  { %344 = vsyncadd [#allocation3], 4294966272  ;;  %v348_v0 = vmov 0.0   ;;  %vm349_vm0 = vmmov 0   ;;  %v308_v1 = vld [vmem:[%s402_s1 + $0x8] sm:$0xff]   ;;  %v309_v2 = vld [vmem:[%s402_s1] sm:$0xff]  }
   0xe   :  { %275 = vmatprep.subr.bf16.mxu0 %v348_v0  ;;  %279 = vmatprep.mubr.msk.bf16.mxu0 %vm349_vm0, %v348_v0  ;;  %v311_v3 = vld [vmem:[#allocation2 + $0x38] sm:$0xff]   ;;  %v310_v4 = vld [vmem:[%s401_s0] sm:$0xff]   ;;  %vm65_vm1 = vcmask 261120   ;;  %v312_v5 = vld [vmem:[#allocation2 + $0x30] sm:$0xff]  }
   0xf   :  { %283 = vmatprep.subr.bf16.mxu1 %v348_v0  ;;  %299 = vmatprep.mubr.msk.bf16.mxu1 %vm349_vm0, %v348_v0  ;;  %v313_v6 = vld [vmem:[#allocation2 + $0x28] sm:$0xff]   ;;  %v314_v7 = vld [vmem:[#allocation2 + $0x20] sm:$0xff]   ;;  %v315_v8 = vld [vmem:[#allocation2 + $0x18] sm:$0xff]  }
  0x10   :  { %276 = vmatpush3.bf16.msra.mxu0 %v308_v1  ;;  %284 = vmatpush3.bf16.msra.mxu1 %v311_v3  ;;  %v316_v9 = vld [vmem:[#allocation2 + $0x10] sm:$0xff]   ;;  %v317_v10 = vld [vmem:[#allocation2 + $0x8] sm:$0xff]   ;;  %v318_v11 = vld [vmem:[#allocation2] sm:$0xff]  }
  0x11   :  { %277 = vmatprep.subr.bf16.mxu0 %v348_v0  ;;  %285 = vmatprep.subr.bf16.mxu1 %v348_v0  ;;  %v240_v12 = vld [vmem:[%s403_s2] ss:$0 sm:$0xff] }
  0x12   :  { %v245_v23 = vld [vmem:[%s405_s4] ss:$0 sm:$0xff] }
  0x14   :  { %278 = vmatpush3.bf16.msra.mxu0 %v309_v2  ;;  %286 = vmatpush3.bf16.msra.mxu1 %v312_v5 }
  0x15   :  { %287 = vmatprep.subr.bf16.mxu1 %v348_v0 }
  0x17   :  { %280 = vmatmul.mubr.msk.bf16.vlgmr.msra.gmra.mxu0 %vm65_vm1, %v310_v4 }
  0x18   :  { %288 = vmatpush3.bf16.msra.mxu1 %v313_v6 }
  0x19   :  { %289 = vmatprep.subr.bf16.mxu1 %v348_v0 }
  0x1c   :  { %290 = vmatpush3.bf16.msra.mxu1 %v314_v7 }
  0x1d   :  { %291 = vmatprep.subr.bf16.mxu1 %v348_v0 }
  0x20   :  { %292 = vmatpush3.bf16.msra.mxu1 %v315_v8 }
  0x21   :  { %293 = vmatprep.subr.bf16.mxu1 %v348_v0 }
  0x24   :  { %294 = vmatpush3.bf16.msra.mxu1 %v316_v9 }
  0x25   :  { %295 = vmatprep.subr.bf16.mxu1 %v348_v0 }
  0x28   :  { %296 = vmatpush3.bf16.msra.mxu1 %v317_v10 }
  0x29   :  { %297 = vmatprep.subr.bf16.mxu1 %v348_v0 }
  0x2c   :  { %298 = vmatpush3.bf16.msra.mxu1 %v318_v11 }
  0xd7   :  { %v103_v13 = vpop.f32.mrf.mxu0 }
  0xd8   :  { %v104_v14 = vadd.f32 %v240_v12, %v103_v13 }
  0xd9   :  { %v281_v15 = vpop.f32.mrf.mxu0 }
  0xda   :  { %319 = vtanh.f32 %v104_v14 }
  0xdb   :  { %v106_v16 = vpop.f32.mrf.mxu0 }
  0xdc   :  { %v107_v17 = vadd.f32 %v240_v12, %v106_v16 }
  0xdd   :  { %v282_v18 = vpop.f32.mrf.mxu0 }
  0xde   :  { %321 = vtanh.f32 %v107_v17 }
  0xe7   :  { %v320_v19 = vpop.eup %319 }
  0xeb   :  { %v322_v20 = vpop.eup %321 }
  0xec   :  { %v112_v21 = vpack.c.bf16 %v322_v20, %v320_v19 }
  0xee   :  { %300 = vmatmul.mubr.bf16.vlgmr.msra.gmra.mxu1 %v112_v21 }
 0x1ae   :  { %v218_v22 = vpop.f32.mrf.mxu1 }
 0x1af   :  { %v219_v26 = vadd.f32 %v245_v23, %v218_v22 }
 0x1b0   :  { %v301_v24 = vpop.f32.mrf.mxu1 }
 0x1b2   :  { %v221_v25 = vpop.f32.mrf.mxu1 }
 0x1b3   :  { %v222_v27 = vadd.f32 %v245_v23, %v221_v25 }
 0x1b4   :  { %v302_v28 = vpop.f32.mrf.mxu1 }
 0x1b5   :  { %v261_v29 = vpack.c.bf16 %v222_v27, %v219_v26 }
 0x1b7   :  { %262 = vst [vmem:[%s406_s5] sm:$0xff] %v261_v29  }
 0x1b8   :  { %239 = vsyncpa [#allocation3], 1 }

</bundles_post_ra>
